<compile_context>
chip_gen: v7x
topology: tpu7x:2x2x1
jax: 0.10.0
libtpu: 0.0.40
codegen_flags: <defaults>
</compile_context>

<pallas_src>
import math

import jax
import jax.numpy as jnp
from jax import lax
from jax.experimental import pallas as pl
from jax.experimental.pallas import tpu as pltpu


_VMEM_LIMIT_BYTES = 32 * 1024 * 1024  # explicit scoped-VMEM request: <= v7x default, > v5e default
_MIN_STRIDED_RUN_BYTES = 512          # below this, a p-only strided read loses more than it saves

_COMPILER_PARAMS = pltpu.CompilerParams(
    dimension_semantics=("parallel",),
    vmem_limit_bytes=_VMEM_LIMIT_BYTES,
)


def _double_buffer_budget_bytes():
    """Per-generation cap on the double-buffered (in+out) VMEM footprint."""
    try:
        kind = jax.devices()[0].device_kind.lower()
    except Exception:
        kind = ""
    if ("v5e" in kind) or ("v5 lite" in kind) or ("v5lite" in kind):
        return 12 * 1024 * 1024   # v5e: stay comfortably inside its tighter budget
    return 24 * 1024 * 1024       # v6e / v7x: <= ~24 MiB under the 32 MiB scoped VMEM


def _target_out_tile_bytes(footprint_multiplier):
    """Output-tile byte target so that (footprint_multiplier x tile) <= budget."""
    return max(1 << 20, _double_buffer_budget_bytes() // max(1, footprint_multiplier))


def _pick_tile_rows(rows, row_bytes, target_tile_bytes, want_multiple_tiles, row_align=8):
    """Row-tile size: ~target bytes per output block, aligned to the sublane
    packing (8 for f32, 16 for bf16, ...), at least 2 grid steps when the row
    count allows (megacore), and preferring tiles that divide `rows` so the
    last grid step is never a ragged OOB-padded block."""
    rows = int(rows)
    a = max(1, int(row_align))
    t = max(a, int(target_tile_bytes) // max(1, int(row_bytes)))
    t = min(t, rows)
    if want_multiple_tiles and rows >= 2 * a:
        t = min(t, (rows + 1) // 2)           # >= 2 grid steps for 2-TC chips
    if t >= rows:
        return rows
    t = max(a, (t // a) * a)
    if t >= rows:
        return rows
    if rows % t == 0:
        return t
    cand = t - a
    lo = max(a, t // 2)
    while cand >= lo:                          # prefer an evenly dividing tile
        if rows % cand == 0:
            return cand
        cand -= a
    return t


def _split_kernel(neg_g2_ref, p_ref, o_ref):
    """Path A: p_ref is (tile_r, half); o_ref is (tile_r, 2*half); half%128==0.

    Two lane-aligned unmasked stores; the q half of x is never read from HBM.
    """
    half = p_ref.shape[-1]
    neg_g2 = neg_g2_ref[0]                                     # f32 scalar (SMEM)
    o_ref[:, :half] = (neg_g2 * p_ref[...]).astype(o_ref.dtype)
    o_ref[:, half:] = jnp.zeros((o_ref.shape[0], o_ref.shape[1] - half), o_ref.dtype)


def _fullread_split_kernel(neg_g2_ref, x_ref, o_ref):
    """Path B: x_ref is (tile_r, d), half%128==0 but the p run is short -> the
    full row is read contiguously; stores stay lane-aligned and unmasked."""
    half = x_ref.shape[-1] // 2
    neg_g2 = neg_g2_ref[0]                                     # f32 scalar (SMEM)
    o_ref[:, :half] = (neg_g2 * x_ref[:, :half]).astype(o_ref.dtype)
    o_ref[:, half:] = jnp.zeros((o_ref.shape[0], o_ref.shape[1] - half), o_ref.dtype)


def _make_masked_kernel(feat_d, half):
    """Masked path: one full-width unmasked store with a row-broadcast p/q select.

    The mask is built from a (1, slab_d) iota once per tile (slab_d element
    modulo only when the slab is a lane-dense repack), not a full-tile iota.
    """
    def kernel(neg_g2_ref, x_ref, o_ref):
        neg_g2 = neg_g2_ref[0]                                 # f32 scalar (SMEM)
        slab_d = x_ref.shape[-1]
        col = lax.broadcasted_iota(jnp.int32, (1, slab_d), 1)
        if slab_d == feat_d:
            is_p = col < half                                  # plain layout: no modulo
        else:
            is_p = (col % feat_d) < half                       # lane-dense repack
        scaled = neg_g2 * x_ref[...]                           # f32 intermediate
        o_ref[...] = jnp.where(is_p, scaled, 0.0).astype(o_ref.dtype)
    return kernel


def friction_block(x, gamma):
    """JAX/Pallas equivalent of FrictionBlock.forward (arbitrary leading dims)."""
    orig_shape = x.shape
    d = int(orig_shape[-1])
    if d % 2 != 0:
        raise ValueError("last dim must be even for chunk(2, dim=-1)")
    half = d // 2

    rows = 1
    for s in orig_shape[:-1]:
        rows *= int(s)
    rows = max(rows, 1)

    itemsize = jnp.dtype(x.dtype).itemsize
    row_align = max(8, (8 * 4) // max(1, itemsize))            # 8 f32, 16 bf16, 32 int8
    # -gamma**2 in f32 (the nn.Parameter is f32); cast happens at the multiply.
    neg_g2 = (-(jnp.asarray(gamma, jnp.float32) ** 2)).reshape((1,))

    aligned = (half % 128 == 0)
    p_only = aligned and (half * itemsize >= _MIN_STRIDED_RUN_BYTES)

    if aligned:
        # ---- lane-aligned split paths: unmasked stores, no select math ----
        x2d = x.reshape(rows, d)
        footprint_mult = 3 if p_only else 4                    # 2*(in+out)/out_tile
        tile_r = _pick_tile_rows(rows, d * itemsize,
                                 _target_out_tile_bytes(footprint_mult),
                                 want_multiple_tiles=True, row_align=row_align)
        grid = (pl.cdiv(rows, tile_r),)
        if p_only:
            kernel = _split_kernel
            in_spec_x = pl.BlockSpec((tile_r, half), lambda i: (i, 0))   # p half only
            bytes_read = rows * half * itemsize
        else:
            kernel = _fullread_split_kernel
            in_spec_x = pl.BlockSpec((tile_r, d), lambda i: (i, 0))      # contiguous row
            bytes_read = rows * d * itemsize
        out2d = pl.pallas_call(
            kernel,
            out_shape=jax.ShapeDtypeStruct((rows, d), x.dtype),
            grid_spec=pl.GridSpec(
                grid=grid,
                in_specs=[
                    pl.BlockSpec(memory_space=pltpu.SMEM),               # -gamma^2
                    in_spec_x,
                ],
                out_specs=pl.BlockSpec((tile_r, d), lambda i: (i, 0)),
            ),
            compiler_params=_COMPILER_PARAMS,
            cost_estimate=pl.CostEstimate(
                flops=rows * half,
                transcendentals=0,
                bytes_accessed=bytes_read + rows * d * itemsize,
            ),
        )(neg_g2, x2d)
        return out2d.reshape(orig_shape)

    # ---- masked path (non-128-aligned half) ----
    slab_rows, slab_d = rows, d
    if d % 128 != 0:
        lane = d * 128 // math.gcd(d, 128)                     # lcm(d, 128)
        if lane <= 2048 and (rows * d) % lane == 0:
            slab_rows, slab_d = (rows * d) // lane, lane       # lane-dense repack
    x_slab = x.reshape(slab_rows, slab_d)
    tile_r = _pick_tile_rows(slab_rows, slab_d * itemsize,
                             _target_out_tile_bytes(4),
                             want_multiple_tiles=True, row_align=row_align)
    grid = (pl.cdiv(slab_rows, tile_r),)
    out_slab = pl.pallas_call(
        _make_masked_kernel(d, half),
        out_shape=jax.ShapeDtypeStruct((slab_rows, slab_d), x.dtype),
        grid_spec=pl.GridSpec(
            grid=grid,
            in_specs=[
                pl.BlockSpec(memory_space=pltpu.SMEM),                   # -gamma^2
                pl.BlockSpec((tile_r, slab_d), lambda i: (i, 0)),
            ],
            out_specs=pl.BlockSpec((tile_r, slab_d), lambda i: (i, 0)),
        ),
        compiler_params=_COMPILER_PARAMS,
        cost_estimate=pl.CostEstimate(
            flops=rows * half,
            transcendentals=0,
            bytes_accessed=2 * rows * d * itemsize,
        ),
    )(neg_g2, x_slab)
    return out_slab.reshape(orig_shape)


if __name__ == "__main__":
    key = jax.random.PRNGKey(0)
    init_gamma = 0.5
    gamma = jnp.float32(init_gamma)

    def reference(x, g):
        p, q = jnp.split(x, 2, axis=-1)
        dp = (-(jnp.float32(g) ** 2) * p).astype(x.dtype)
        return jnp.concatenate((dp, jnp.zeros_like(q)), axis=-1)

    k1, k2, k3 = jax.random.split(key, 3)

    # Small feature dim (batch=2, seq=8, hidden=32) -> lane-dense masked path.
    x_small = jax.random.normal(k1, (2, 8, 32), dtype=jnp.float32)
    out_small = jax.block_until_ready(friction_block(x_small, gamma))
    assert out_small.shape == x_small.shape and out_small.dtype == x_small.dtype
    assert jnp.allclose(out_small, reference(x_small, gamma), atol=1e-6)

    # 128-aligned half, f32 (rows=16, hidden=256) -> p-only-read aligned path.
    x_aligned = jax.random.normal(k2, (16, 256), dtype=jnp.float32)
    out_aligned = jax.block_until_ready(friction_block(x_aligned, gamma))
    assert jnp.allclose(out_aligned, reference(x_aligned, gamma), atol=1e-6)

    # 128-aligned half, bf16 (short strided run) -> full-read aligned split path.
    x_bf16 = jax.random.normal(k3, (16, 256), dtype=jnp.bfloat16)
    out_bf16 = jax.block_until_ready(friction_block(x_bf16, gamma))
    assert out_bf16.dtype == jnp.bfloat16
    assert jnp.allclose(out_bf16.astype(jnp.float32),
                        reference(x_bf16, gamma).astype(jnp.float32), atol=1e-2)

    print("KERNEL_OK")
</pallas_src>

<mosaic_0001>
module attributes {stable_mosaic.version = 11 : i64} {
  func.func @kernel(%arg0: i32, %arg1: memref<1xf32, #tpu.memory_space<smem>>, %arg2: memref<4x128xf32, #tpu.memory_space<vmem>>, %arg3: memref<4x128xf32, #tpu.memory_space<vmem>>) attributes {dimension_semantics = [#tpu.dimension_semantics<parallel>], iteration_bounds = array<i64: 1>, scalar_prefetch = 0 : i64, scratch_operands = 0 : i64, tpu.core_type = #tpu.core_type<tc>, window_params = [{transform_indices = @transform_0, window_bounds = array<i64: 1>}, {transform_indices = @transform_1, window_bounds = array<i64: 4, 128>}, {transform_indices = @transform_2, window_bounds = array<i64: 4, 128>}]} {
    %c0 = arith.constant 0 : index
    %0 = memref.load %arg1[%c0] : memref<1xf32, #tpu.memory_space<smem>>
    %1 = tpu.iota {dimensions = array<i32: 1>} : vector<1x128xi32>
    %c32_i32 = arith.constant 32 : i32
    %c0_i32 = arith.constant 0 : i32
    %2 = arith.cmpi eq, %c32_i32, %c0_i32 : i32
    %c1_i32 = arith.constant 1 : i32
    %3 = arith.select %2, %c1_i32, %c32_i32 : i32
    %4 = vector.broadcast %3 : i32 to vector<1x128xi32>
    %5 = arith.remsi %1, %4 : vector<1x128xi32>
    %c0_i32_0 = arith.constant 0 : i32
    %6 = vector.broadcast %c0_i32_0 : i32 to vector<1x128xi32>
    %7 = arith.cmpi ne, %5, %6 : vector<1x128xi32>
    %c0_i32_1 = arith.constant 0 : i32
    %8 = vector.broadcast %c0_i32_1 : i32 to vector<1x128xi32>
    %9 = arith.cmpi slt, %5, %8 : vector<1x128xi32>
    %c0_i32_2 = arith.constant 0 : i32
    %10 = arith.cmpi slt, %3, %c0_i32_2 : i32
    %11 = vector.broadcast %10 : i1 to vector<1x128xi1>
    %12 = vector.broadcast %11 : vector<1x128xi1> to vector<1x128xi1>
    %13 = arith.xori %9, %12 : vector<1x128xi1>
    %14 = arith.andi %13, %7 : vector<1x128xi1>
    %15 = vector.broadcast %3 : i32 to vector<1x128xi32>
    %16 = arith.addi %5, %15 : vector<1x128xi32>
    %17 = arith.select %14, %16, %5 : vector<1x128xi1>, vector<1x128xi32>
    %c16_i32 = arith.constant 16 : i32
    %18 = vector.broadcast %c16_i32 : i32 to vector<1x128xi32>
    %19 = arith.cmpi slt, %17, %18 : vector<1x128xi32>
    %c0_3 = arith.constant 0 : index
    %c0_4 = arith.constant 0 : index
    %20 = vector.load %arg2[%c0_3, %c0_4] : memref<4x128xf32, #tpu.memory_space<vmem>>, vector<4x128xf32>
    %21 = vector.broadcast %0 : f32 to vector<4x128xf32>
    %22 = arith.mulf %21, %20 : vector<4x128xf32>
    %cst = arith.constant 0.000000e+00 : f32
    %23 = vector.shape_cast %19 : vector<1x128xi1> to vector<1x128xi1>
    %24 = vector.broadcast %23 : vector<1x128xi1> to vector<4x128xi1>
    %25 = vector.broadcast %cst : f32 to vector<4x128xf32>
    %26 = arith.select %24, %22, %25 : vector<4x128xi1>, vector<4x128xf32>
    %c0_5 = arith.constant 0 : index
    %c0_6 = arith.constant 0 : index
    %27 = vector.load %arg3[%c0_5, %c0_6] : memref<4x128xf32, #tpu.memory_space<vmem>>, vector<4x128xf32>
    tpu.vector_store %arg3[%c0_5, %c0_6], %26 {strides = array<i32>} : memref<4x128xf32, #tpu.memory_space<vmem>>, vector<4x128xf32>,
    return
  }
  func.func @transform_0(%arg0: i32) -> i32 {
    %c0_i32 = arith.constant 0 : i32
    %c0_i32_0 = arith.constant 0 : i32
    return %c0_i32 : i32
  }
  func.func @transform_1(%arg0: i32) -> (i32, i32) {
    %c0_i32 = arith.constant 0 : i32
    %c0_i32_0 = arith.constant 0 : i32
    return %arg0, %c0_i32 : i32, i32
  }
  func.func @transform_2(%arg0: i32) -> (i32, i32) {
    %c0_i32 = arith.constant 0 : i32
    %c0_i32_0 = arith.constant 0 : i32
    return %arg0, %c0_i32 : i32, i32
  }
}

</mosaic_0001>

<bundles_post_ra>
// kernel: tpu_custom_call.1
= control target key start
LH: loop header
LB: loop body
LE: loop exit
PB: predicated region body
PF: predicated region fallthrough
CT: control target
= control target key end

     0   :  { %8 = vsyncpa [#allocation4], 0  ;;  %s157_s0 = inlined_call_operand.<no memory space> [shape: f32[1], index: 0, kind: input, shape index: {}]   ;;  %s158_s1 = inlined_call_operand.hbm [shape: f32[4,128], index: 1, kind: input, shape index: {}]   ;;  %s159_s2 = inlined_call_operand.hbm [shape: f32[4,128], index: 2, kind: output, shape index: {}]  }
   0x1   :  { %9 = vsyncpa [#allocation5], 0  ;;  %s113_s9 = smov [#allocation3]   ;;  %s65_s13 = scalar_lea.hbm %s158_s1, 64 }
   0x2   :  { %s18_s10 = sshll.u32 %s113_s9, 4  ;;  %p66_p0 = scmp.ne.s32.totalorder %s158_s1, %s65_s13  ;;  %s19_s10 = int_to_ptr.vmem [resolvable:$true] %s18_s10 }
   0x3   :  { %p69_p1 = scmp.lt.u32.totalorder %s65_s13, %s158_s1 }
   0x5   :  { %p71_p2 = pnand %p69_p1, %p66_p0 }
   0x7   :  { %74 = shalt.err (!%p71_p2)
}
   0x8   :  { %s75_s18 = scalar_lea.vmem %s19_s10, 64  ;;  %p80_p4 = scmp.lt.s32.totalorder %s19_s10, %s19_s10 }
   0x9   :  { %p76_p3 = scmp.ne.s32.totalorder %s19_s10, %s75_s18  ;;  %p81_p5 = scmp.lt.s32.totalorder %s75_s18, %s75_s18 }
   0xb   :  { %p82_p6 = por %p81_p5, %p80_p4 }
   0xd   :  { %p83_p7 = pnand %p82_p6, %p76_p3 }
   0xf   :  { %86 = shalt.err (!%p83_p7)
}
  0x10   :  { %21 = dma.hbm_to_vmem [thread:$0]  %s158_s1, 64, %s19_s10, [#allocation4]  }
  0x11   :  { %109 = dma.done.wait [#allocation4], 64  }
  0x12   :  { %110 = vsyncadd [#allocation4], 4294967232  ;;  %v26_v0 = vlaneseq  ;;  %v42_v3 = vstv %s157_s0  ;;  %s114_s23 = smov [#allocation6]   ;;  %v41_v4 = vld [vmem:[#allocation3] sm:$0xf] }
  0x13   :  { %s54_s24 = sshll.u32 %s114_s23, 4  ;;  %v43_v5 = vmul.f32 %v42_v3, %v41_v4  ;;  %s55_s24 = int_to_ptr.vmem [resolvable:$true] %s54_s24 }
  0x14   :  { %v27_v1 = vand.u32 127, %v26_v0  ;;  %s87_s25 = scalar_lea.vmem %s55_s24, 64  ;;  %p92_p9 = scmp.lt.s32.totalorder %s55_s24, %s55_s24 }
  0x15   :  { %p88_p8 = scmp.ne.s32.totalorder %s55_s24, %s87_s25  ;;  %p93_p10 = scmp.lt.s32.totalorder %s87_s25, %s87_s25 }
  0x16   :  { %v32_v2 = vand.u32 31, %v27_v1 }
  0x17   :  { %p94_p11 = por %p93_p10, %p92_p9 }
  0x18   :  { %vm40_vm0 = vcmp.lt.s32.totalorder %v32_v2, 16 }
  0x19   :  { %v46_v6 = vsel %vm40_vm0, %v43_v5, 0.0  ;;  %p95_p12 = pnand %p94_p11, %p88_p8 }
  0x1a   :  { %47 = vst [vmem:[#allocation6] sm:$0xf] %v46_v6 }
  0x1b   :  { %98 = shalt.err (!%p95_p12)
}
  0x1c   :  { %s99_s27 = scalar_lea.hbm %s159_s2, 64 }
  0x1d   :  { %p100_p13 = scmp.ne.s32.totalorder %s159_s2, %s99_s27  ;;  %p103_p0 = scmp.lt.u32.totalorder %s99_s27, %s159_s2 }
  0x1f   :  { %p105_p1 = pnand %p103_p0, %p100_p13 }
  0x21   :  { %108 = shalt.err (!%p105_p1)
}
  0x22   :  { %57 = dma.vmem_to_hbm [thread:$0]  %s55_s24, 64, %s159_s2, [#allocation5]  }
  0x23   :  { %111 = dma.done.wait [#allocation5], 64  }
  0x24   :  { %112 = vsyncadd [#allocation5], 4294967232 }
  0x25   :  { %61 = vsyncpa [#allocation4], 1 }
  0x26   :  { %62 = vsyncpa [#allocation5], 1 }

</bundles_post_ra>
